<compile_context>
chip_gen: v7x
topology: tpu7x:2x2x1
jax: 0.10.0
libtpu: 0.0.40
codegen_flags: <defaults>
</compile_context>

<pallas_src>
import functools

import jax
import jax.numpy as jnp
import numpy as np
from jax.experimental import pallas as pl
from jax.experimental.pallas import tpu as pltpu

_SUBLANE_TARGET = 128


def _cdiv(a, b):
    return -(-a // b)


def _lane_target():
    # 256-wide MXU on v6e / v7x; 128 on v5e and anything unknown.
    try:
        kind = jax.devices()[0].device_kind.lower()
    except Exception:
        return 128
    if any(tag in kind for tag in ("v6", "v7", "7x")):
        return 256
    return 128


def _band_matrices(H, W, Gh, Gw, patch_size):
    """Host-side banded conv / pooled-conv matrices (entries 0/0.5/1, exact in bf16)."""
    pad_lo = -(patch_size // 2)
    pad_hi = patch_size - 1 - (patch_size // 2)

    def in_band(d):
        return (d >= pad_lo) & (d <= pad_hi)

    Hh, Wh = H // 2, W // 2
    Hp, Wp, Hph = Gh * H, Gw * W, Gh * Hh

    # Row box-conv (applied as BH @ x), block-diagonal over Gh images stacked in H.
    o = np.arange(Hp)[:, None]
    i = np.arange(Hp)[None, :]
    bh = ((o // H == i // H) & in_band(i % H - o % H)).astype(np.float32)

    # Column box-conv (applied as x @ AWT), block-diagonal over Gw images along W.
    iw = np.arange(Wp)[:, None]
    ow = np.arange(Wp)[None, :]
    awt = ((iw // W == ow // W) & in_band(iw % W - ow % W)).astype(np.float32)

    # Fused 2x2-pool + box-conv along rows (entries 0.5).
    o2 = np.arange(Hph)[:, None]
    i2 = np.arange(Hp)[None, :]
    bhp = 0.5 * ((o2 // Hh == i2 // H)
                 & in_band((i2 % H) // 2 - o2 % Hh)).astype(np.float32)

    # Fused pool + conv along columns for one chroma plane: (Wp, Wp//2).
    iw2 = np.arange(Wp)[:, None]
    ow2 = np.arange(Wp // 2)[None, :]
    pawt = 0.5 * ((iw2 // W == ow2 // Wh)
                  & in_band((iw2 % W) // 2 - ow2 % Wh)).astype(np.float32)

    # U / V fused along the lane axis: block-diagonal pair of pawt.
    pawt_uv = np.zeros((2 * Wp, Wp), np.float32)
    pawt_uv[:Wp, : Wp // 2] = pawt
    pawt_uv[Wp:, Wp // 2:] = pawt

    bf16 = jnp.bfloat16
    return (jnp.asarray(bh, bf16), jnp.asarray(awt, bf16),
            jnp.asarray(bhp, bf16), jnp.asarray(pawt_uv, bf16))


def _loss_kernel(in_ref, tg_ref, bh_ref, awt_ref, bhp_ref, pawt_ref, o_ref):
    f32 = jnp.float32
    bf16 = jnp.bfloat16

    # RGB diff (f32) -> YUV diff.  Conv / pool / colour transform are linear,
    # so forming the diff first halves the matmul work; +128 offsets cancel.
    d_r = in_ref[0].astype(f32) - tg_ref[0].astype(f32)
    d_g = in_ref[1].astype(f32) - tg_ref[1].astype(f32)
    d_b = in_ref[2].astype(f32) - tg_ref[2].astype(f32)
    dy = (0.299 * d_r + 0.587 * d_g + 0.114 * d_b).astype(bf16)
    du = (-0.169 * d_r - 0.331 * d_g + 0.5 * d_b).astype(bf16)
    dv = (0.5 * d_r - 0.46 * d_g - 0.04 * d_b).astype(bf16)
    duv = jnp.concatenate([du, dv], axis=-1)              # (Hp, 2*Wp)

    def mm(a, b):
        return jnp.dot(a, b, preferred_element_type=jnp.float32)

    # Luma: full-res box conv.  Chroma: fused 2x2 pool + box conv; U and V
    # share one matmul pair via the block-diagonal pawt_uv.
    cy = mm(mm(bh_ref[...], dy).astype(bf16), awt_ref[...])       # (Hp, Wp)
    cuv = mm(mm(bhp_ref[...], duv).astype(bf16), pawt_ref[...])   # (Hph, Wp)

    # Lane-dense per-lane partial SSEs (sublane-only reduction; the lane /
    # batch reduction is finished in the wrapper).
    psy = jnp.sum(cy * cy, axis=0, keepdims=True)          # (1, Wp)
    psuv = jnp.sum(cuv * cuv, axis=0, keepdims=True)        # (1, Wp)
    o_ref[...] = jnp.concatenate([psy, psuv], axis=0)[None]  # (1, 2, Wp)


def yuv420_channel_loss(inp, tgt, patch_size=15):
    """Pallas TPU forward of YUV420ChannelLoss (matches the PyTorch module)."""
    N, C, H, W = inp.shape
    assert C == 3 and H % 2 == 0 and W % 2 == 0
    assert tgt.shape == inp.shape
    assert patch_size % 2 == 1, "box conv with padding P//2 assumes odd P"

    # --- Group selection: pack images along lanes (W) and sublanes (H) so the
    # MXU sees near-full tiles even for small images.  The batch is zero-padded
    # to a multiple of the group size (zero diff => zero contribution).
    lane_target = _lane_target()
    Gw = max(1, min(N, lane_target // W))
    n_lane_groups = _cdiv(N, Gw)
    Gh = max(1, min(_SUBLANE_TARGET // H, n_lane_groups))
    if n_lane_groups > 1 and _cdiv(n_lane_groups, Gh) < 2:
        # Keep >=2 grid steps when there is enough data (v7x has 2 TCs).
        Gh = max(1, _cdiv(n_lane_groups, 2))
    G = Gh * Gw
    Np = _cdiv(N, G) * G
    NG = Np // G
    Hp, Wp = Gh * H, Gw * W
    Hph = Gh * (H // 2)

    if Np != N:
        padn = Np - N
        inp = jnp.concatenate([inp, jnp.zeros((padn, C, H, W), inp.dtype)], 0)
        tgt = jnp.concatenate([tgt, jnp.zeros((padn, C, H, W), tgt.dtype)], 0)

    def pack(x):
        # (Np,3,H,W) -> (NG, 3, Gh*H, Gw*W); native dtype (no f32 up-cast).
        x = x.reshape(NG, Gh, Gw, C, H, W)
        return jnp.transpose(x, (0, 3, 1, 4, 2, 5)).reshape(NG, C, Hp, Wp)

    bh, awt, bhp, pawt_uv = _band_matrices(H, W, Gh, Gw, patch_size)

    img_spec = pl.BlockSpec((pl.Squeezed(), C, Hp, Wp), lambda g: (g, 0, 0, 0))

    def const_spec(shape):
        # Constant block index -> DMA'd once, stays resident across grid steps.
        return pl.BlockSpec(shape, lambda g: (0,) * len(shape))

    # VMEM budget from the actual block footprint (kept under v7x's 64 MiB).
    itemsize = jnp.dtype(inp.dtype).itemsize
    in_bytes = 2 * 2 * C * Hp * Wp * itemsize                       # 2 inputs x 2 bufs
    const_bytes = 2 * 2 * (Hp * Hp + Wp * Wp + Hph * Hp + 2 * Wp * Wp)  # bf16 x 2 bufs
    scratch_bytes = 12 * Hp * Wp * 4                                # diffs + intermediates
    vmem_limit = int(min(max(in_bytes + const_bytes + scratch_bytes + (8 << 20),
                             16 << 20), 64 << 20))

    partials = pl.pallas_call(
        _loss_kernel,
        out_shape=jax.ShapeDtypeStruct((NG, 2, Wp), jnp.float32),
        grid=(NG,),
        in_specs=[img_spec, img_spec,
                  const_spec((Hp, Hp)), const_spec((Wp, Wp)),
                  const_spec((Hph, Hp)), const_spec((2 * Wp, Wp))],
        out_specs=pl.BlockSpec((1, 2, Wp), lambda g: (g, 0, 0)),
        compiler_params=pltpu.CompilerParams(
            dimension_semantics=("parallel",),   # batch axis is megacore-shardable
            vmem_limit_bytes=vmem_limit,
        ),
    )(pack(inp), pack(tgt), bh, awt, bhp, pawt_uv)
    # TODO(synk): very large images (~1K+ wide) want strip-tiled band matrices
    # (halo = 2*(patch//2)) or a separable shift-add box filter instead of the
    # dense (Hp,Hp)/(Wp,Wp) matrices used by this small-image path.

    # Tiny final glue: reduce per-lane / per-group partial SSEs and normalise
    # to MSE with the *unpadded* batch size (padded groups contribute 0).
    sse_y = jnp.sum(partials[:, 0, :])
    sse_uv = jnp.sum(partials[:, 1, :])            # U and V share a denominator
    return sse_y / (N * H * W) + sse_uv / (N * (H // 2) * (W // 2))


def reference_loss(inp, tgt, patch_size=15):
    # Pure-JAX reference mirroring the PyTorch module exactly (f32 throughout).
    pad = patch_size // 2

    def rgb_to_yuv420(rgb):
        r, g, b = rgb[:, 0], rgb[:, 1], rgb[:, 2]
        y = 0.299 * r + 0.587 * g + 0.114 * b
        u = -0.169 * r - 0.331 * g + 0.5 * b + 128.0
        v = 0.5 * r - 0.46 * g - 0.04 * b + 128.0

        def pool(x):
            n, h, w = x.shape
            return x.reshape(n, h // 2, 2, w // 2, 2).mean(axis=(2, 4))

        return y, pool(u), pool(v)

    kernel = jnp.ones((1, 1, patch_size, patch_size), jnp.float32)

    def box(x):
        return jax.lax.conv_general_dilated(
            x[:, None], kernel, window_strides=(1, 1),
            padding=[(pad, pad), (pad, pad)],
            dimension_numbers=("NCHW", "OIHW", "NCHW"))[:, 0]

    yi, ui, vi = rgb_to_yuv420(inp.astype(jnp.float32))
    yt, ut, vt = rgb_to_yuv420(tgt.astype(jnp.float32))
    mse = lambda a, b: jnp.mean((a - b) ** 2)
    return mse(box(yi), box(yt)) + mse(box(ui), box(ut)) + mse(box(vi), box(vt))


if __name__ == "__main__":
    key = jax.random.PRNGKey(0)
    k1, k2 = jax.random.split(key)
    N, C, H, W = 2, 3, 16, 16
    inp = jax.random.uniform(k1, (N, C, H, W), jnp.float32, 0.0, 255.0)
    tgt = jax.random.uniform(k2, (N, C, H, W), jnp.float32, 0.0, 255.0)

    loss_fn = jax.jit(functools.partial(yuv420_channel_loss, patch_size=15))
    loss = jax.block_until_ready(loss_fn(inp, tgt))

    ref = reference_loss(inp, tgt, patch_size=15)
    np.testing.assert_allclose(np.asarray(loss), np.asarray(ref),
                               rtol=1e-2, atol=1e-2)
    print("KERNEL_OK")
</pallas_src>

<mosaic_0001>
module attributes {stable_mosaic.version = 11 : i64} {
  func.func @_loss_kernel(%arg0: i32, %arg1: memref<1x3x16x32xf32, #tpu.memory_space<vmem>>, %arg2: memref<1x3x16x32xf32, #tpu.memory_space<vmem>>, %arg3: memref<16x16xbf16, #tpu.memory_space<vmem>>, %arg4: memref<32x32xbf16, #tpu.memory_space<vmem>>, %arg5: memref<8x16xbf16, #tpu.memory_space<vmem>>, %arg6: memref<64x32xbf16, #tpu.memory_space<vmem>>, %arg7: memref<1x2x32xf32, #tpu.memory_space<vmem>>) attributes {dimension_semantics = [#tpu.dimension_semantics<parallel>], iteration_bounds = array<i64: 1>, scalar_prefetch = 0 : i64, scratch_operands = 0 : i64, tpu.core_type = #tpu.core_type<tc>, window_params = [{transform_indices = @transform_0, window_bounds = array<i64: 1, 3, 16, 32>}, {transform_indices = @transform_1, window_bounds = array<i64: 1, 3, 16, 32>}, {pipeline_mode = #tpu.pipeline_mode<synchronous>, transform_indices = @transform_2, window_bounds = array<i64: 16, 16>}, {pipeline_mode = #tpu.pipeline_mode<synchronous>, transform_indices = @transform_3, window_bounds = array<i64: 32, 32>}, {pipeline_mode = #tpu.pipeline_mode<synchronous>, transform_indices = @transform_4, window_bounds = array<i64: 8, 16>}, {pipeline_mode = #tpu.pipeline_mode<synchronous>, transform_indices = @transform_5, window_bounds = array<i64: 64, 32>}, {transform_indices = @transform_6, window_bounds = array<i64: 1, 2, 32>}]} {
    %c0 = arith.constant 0 : index
    %c0_0 = arith.constant 0 : index
    %c0_1 = arith.constant 0 : index
    %c0_2 = arith.constant 0 : index
    %0 = vector.load %arg1[%c0, %c0_0, %c0_1, %c0_2] : memref<1x3x16x32xf32, #tpu.memory_space<vmem>>, vector<1x1x16x32xf32>
    %1 = vector.shape_cast %0 : vector<1x1x16x32xf32> to vector<16x32xf32>
    %c0_3 = arith.constant 0 : index
    %c0_4 = arith.constant 0 : index
    %c0_5 = arith.constant 0 : index
    %c0_6 = arith.constant 0 : index
    %2 = vector.load %arg2[%c0_3, %c0_4, %c0_5, %c0_6] : memref<1x3x16x32xf32, #tpu.memory_space<vmem>>, vector<1x1x16x32xf32>
    %3 = vector.shape_cast %2 : vector<1x1x16x32xf32> to vector<16x32xf32>
    %4 = arith.subf %1, %3 : vector<16x32xf32>
    %c0_7 = arith.constant 0 : index
    %c1 = arith.constant 1 : index
    %c0_8 = arith.constant 0 : index
    %c0_9 = arith.constant 0 : index
    %5 = vector.load %arg1[%c0_7, %c1, %c0_8, %c0_9] : memref<1x3x16x32xf32, #tpu.memory_space<vmem>>, vector<1x1x16x32xf32>
    %6 = vector.shape_cast %5 : vector<1x1x16x32xf32> to vector<16x32xf32>
    %c0_10 = arith.constant 0 : index
    %c1_11 = arith.constant 1 : index
    %c0_12 = arith.constant 0 : index
    %c0_13 = arith.constant 0 : index
    %7 = vector.load %arg2[%c0_10, %c1_11, %c0_12, %c0_13] : memref<1x3x16x32xf32, #tpu.memory_space<vmem>>, vector<1x1x16x32xf32>
    %8 = vector.shape_cast %7 : vector<1x1x16x32xf32> to vector<16x32xf32>
    %9 = arith.subf %6, %8 : vector<16x32xf32>
    %c0_14 = arith.constant 0 : index
    %c2 = arith.constant 2 : index
    %c0_15 = arith.constant 0 : index
    %c0_16 = arith.constant 0 : index
    %10 = vector.load %arg1[%c0_14, %c2, %c0_15, %c0_16] : memref<1x3x16x32xf32, #tpu.memory_space<vmem>>, vector<1x1x16x32xf32>
    %11 = vector.shape_cast %10 : vector<1x1x16x32xf32> to vector<16x32xf32>
    %c0_17 = arith.constant 0 : index
    %c2_18 = arith.constant 2 : index
    %c0_19 = arith.constant 0 : index
    %c0_20 = arith.constant 0 : index
    %12 = vector.load %arg2[%c0_17, %c2_18, %c0_19, %c0_20] : memref<1x3x16x32xf32, #tpu.memory_space<vmem>>, vector<1x1x16x32xf32>
    %13 = vector.shape_cast %12 : vector<1x1x16x32xf32> to vector<16x32xf32>
    %14 = arith.subf %11, %13 : vector<16x32xf32>
    %cst = arith.constant 2.990000e-01 : f32
    %15 = vector.broadcast %cst : f32 to vector<16x32xf32>
    %16 = arith.mulf %15, %4 : vector<16x32xf32>
    %cst_21 = arith.constant 5.870000e-01 : f32
    %17 = vector.broadcast %cst_21 : f32 to vector<16x32xf32>
    %18 = arith.mulf %17, %9 : vector<16x32xf32>
    %19 = arith.addf %16, %18 : vector<16x32xf32>
    %cst_22 = arith.constant 1.140000e-01 : f32
    %20 = vector.broadcast %cst_22 : f32 to vector<16x32xf32>
    %21 = arith.mulf %20, %14 : vector<16x32xf32>
    %22 = arith.addf %19, %21 : vector<16x32xf32>
    %23 = arith.truncf %22 : vector<16x32xf32> to vector<16x32xbf16>
    %cst_23 = arith.constant -1.690000e-01 : f32
    %24 = vector.broadcast %cst_23 : f32 to vector<16x32xf32>
    %25 = arith.mulf %24, %4 : vector<16x32xf32>
    %cst_24 = arith.constant 3.310000e-01 : f32
    %26 = vector.broadcast %cst_24 : f32 to vector<16x32xf32>
    %27 = arith.mulf %26, %9 : vector<16x32xf32>
    %28 = arith.subf %25, %27 : vector<16x32xf32>
    %cst_25 = arith.constant 5.000000e-01 : f32
    %29 = vector.broadcast %cst_25 : f32 to vector<16x32xf32>
    %30 = arith.mulf %29, %14 : vector<16x32xf32>
    %31 = arith.addf %28, %30 : vector<16x32xf32>
    %32 = arith.truncf %31 : vector<16x32xf32> to vector<16x32xbf16>
    %cst_26 = arith.constant 5.000000e-01 : f32
    %33 = vector.broadcast %cst_26 : f32 to vector<16x32xf32>
    %34 = arith.mulf %33, %4 : vector<16x32xf32>
    %cst_27 = arith.constant 4.600000e-01 : f32
    %35 = vector.broadcast %cst_27 : f32 to vector<16x32xf32>
    %36 = arith.mulf %35, %9 : vector<16x32xf32>
    %37 = arith.subf %34, %36 : vector<16x32xf32>
    %cst_28 = arith.constant 4.000000e-02 : f32
    %38 = vector.broadcast %cst_28 : f32 to vector<16x32xf32>
    %39 = arith.mulf %38, %14 : vector<16x32xf32>
    %40 = arith.subf %37, %39 : vector<16x32xf32>
    %41 = arith.truncf %40 : vector<16x32xf32> to vector<16x32xbf16>
    %42 = tpu.concatenate %32, %41 in 1 : vector<16x32xbf16>, vector<16x32xbf16> -> vector<16x64xbf16>
    %c0_29 = arith.constant 0 : index
    %c0_30 = arith.constant 0 : index
    %43 = vector.load %arg3[%c0_29, %c0_30] : memref<16x16xbf16, #tpu.memory_space<vmem>>, vector<16x16xbf16>
    %cst_31 = arith.constant dense<0.000000e+00> : vector<16x32xf32>
    %44 = tpu.matmul %43, %23, %cst_31 {dimension_numbers = #tpu.dot_dimension_numbers<[1], [0], [0], [1], [0, 0, 1, 1], [], []>} : vector<16x16xbf16>, vector<16x32xbf16>, vector<16x32xf32> -> vector<16x32xf32>
    %45 = arith.truncf %44 : vector<16x32xf32> to vector<16x32xbf16>
    %c0_32 = arith.constant 0 : index
    %c0_33 = arith.constant 0 : index
    %46 = vector.load %arg4[%c0_32, %c0_33] : memref<32x32xbf16, #tpu.memory_space<vmem>>, vector<32x32xbf16>
    %cst_34 = arith.constant dense<0.000000e+00> : vector<16x32xf32>
    %47 = tpu.matmul %45, %46, %cst_34 {dimension_numbers = #tpu.dot_dimension_numbers<[1], [0], [0], [1], [0, 0, 1, 1], [], []>} : vector<16x32xbf16>, vector<32x32xbf16>, vector<16x32xf32> -> vector<16x32xf32>
    %c0_35 = arith.constant 0 : index
    %c0_36 = arith.constant 0 : index
    %48 = vector.load %arg5[%c0_35, %c0_36] : memref<8x16xbf16, #tpu.memory_space<vmem>>, vector<8x16xbf16>
    %cst_37 = arith.constant dense<0.000000e+00> : vector<8x64xf32>
    %49 = tpu.matmul %48, %42, %cst_37 {dimension_numbers = #tpu.dot_dimension_numbers<[1], [0], [0], [1], [0, 0, 1, 1], [], []>} : vector<8x16xbf16>, vector<16x64xbf16>, vector<8x64xf32> -> vector<8x64xf32>
    %50 = arith.truncf %49 : vector<8x64xf32> to vector<8x64xbf16>
    %c0_38 = arith.constant 0 : index
    %c0_39 = arith.constant 0 : index
    %51 = vector.load %arg6[%c0_38, %c0_39] : memref<64x32xbf16, #tpu.memory_space<vmem>>, vector<64x32xbf16>
    %cst_40 = arith.constant dense<0.000000e+00> : vector<8x32xf32>
    %52 = tpu.matmul %50, %51, %cst_40 {dimension_numbers = #tpu.dot_dimension_numbers<[1], [0], [0], [1], [0, 0, 1, 1], [], []>} : vector<8x64xbf16>, vector<64x32xbf16>, vector<8x32xf32> -> vector<8x32xf32>
    %53 = arith.mulf %47, %47 : vector<16x32xf32>
    %cst_41 = arith.constant dense<0.000000e+00> : vector<32xf32>
    %54 = vector.multi_reduction <add>, %53, %cst_41 [0] : vector<16x32xf32> to vector<32xf32>
    %55 = vector.shape_cast %54 : vector<32xf32> to vector<1x32xf32>
    %56 = arith.mulf %52, %52 : vector<8x32xf32>
    %cst_42 = arith.constant dense<0.000000e+00> : vector<32xf32>
    %57 = vector.multi_reduction <add>, %56, %cst_42 [0] : vector<8x32xf32> to vector<32xf32>
    %58 = vector.shape_cast %57 : vector<32xf32> to vector<1x32xf32>
    %59 = tpu.concatenate %55, %58 in 0 : vector<1x32xf32>, vector<1x32xf32> -> vector<2x32xf32>
    %60 = vector.shape_cast %59 : vector<2x32xf32> to vector<1x2x32xf32>
    %c0_43 = arith.constant 0 : index
    %c0_44 = arith.constant 0 : index
    %c0_45 = arith.constant 0 : index
    %61 = vector.load %arg7[%c0_43, %c0_44, %c0_45] : memref<1x2x32xf32, #tpu.memory_space<vmem>>, vector<1x2x32xf32>
    tpu.vector_store %arg7[%c0_43, %c0_44, %c0_45], %60 {strides = array<i32>} : memref<1x2x32xf32, #tpu.memory_space<vmem>>, vector<1x2x32xf32>,
    return
  }
  func.func @transform_0(%arg0: i32) -> (i32, i32, i32, i32) {
    %c0_i32 = arith.constant 0 : i32
    %c0_i32_0 = arith.constant 0 : i32
    %c0_i32_1 = arith.constant 0 : i32
    %c0_i32_2 = arith.constant 0 : i32
    return %arg0, %c0_i32, %c0_i32_0, %c0_i32_1 : i32, i32, i32, i32
  }
  func.func @transform_1(%arg0: i32) -> (i32, i32, i32, i32) {
    %c0_i32 = arith.constant 0 : i32
    %c0_i32_0 = arith.constant 0 : i32
    %c0_i32_1 = arith.constant 0 : i32
    %c0_i32_2 = arith.constant 0 : i32
    return %arg0, %c0_i32, %c0_i32_0, %c0_i32_1 : i32, i32, i32, i32
  }
  func.func @transform_2(%arg0: i32) -> (i32, i32) {
    %c0_i32 = arith.constant 0 : i32
    %c0_i32_0 = arith.constant 0 : i32
    %c0_i32_1 = arith.constant 0 : i32
    return %c0_i32, %c0_i32_0 : i32, i32
  }
  func.func @transform_3(%arg0: i32) -> (i32, i32) {
    %c0_i32 = arith.constant 0 : i32
    %c0_i32_0 = arith.constant 0 : i32
    %c0_i32_1 = arith.constant 0 : i32
    return %c0_i32, %c0_i32_0 : i32, i32
  }
  func.func @transform_4(%arg0: i32) -> (i32, i32) {
    %c0_i32 = arith.constant 0 : i32
    %c0_i32_0 = arith.constant 0 : i32
    %c0_i32_1 = arith.constant 0 : i32
    return %c0_i32, %c0_i32_0 : i32, i32
  }
  func.func @transform_5(%arg0: i32) -> (i32, i32) {
    %c0_i32 = arith.constant 0 : i32
    %c0_i32_0 = arith.constant 0 : i32
    %c0_i32_1 = arith.constant 0 : i32
    return %c0_i32, %c0_i32_0 : i32, i32
  }
  func.func @transform_6(%arg0: i32) -> (i32, i32, i32) {
    %c0_i32 = arith.constant 0 : i32
    %c0_i32_0 = arith.constant 0 : i32
    %c0_i32_1 = arith.constant 0 : i32
    return %arg0, %c0_i32, %c0_i32_0 : i32, i32, i32
  }
}

</mosaic_0001>

<bundles_post_ra>
// kernel: yuv420_channel_loss.1
= control target key start
LH: loop header
LB: loop body
LE: loop exit
PB: predicated region body
PF: predicated region fallthrough
CT: control target
= control target key end

     0   :  { %v421_v0 = vmov 0.0   ;;  %vm422_vm0 = vmmov 0   ;;  %vm94_vm1 = vcmask 130048   ;;  %s423_s23 = smov 32   ;;  %vm82_vm2 = vcmask 261120   ;;  %s545_s0 = inlined_call_operand.vmem [shape: f32[1,3,16,32], index: 0, kind: input, shape index: {}]   ;;  %s546_s1 = inlined_call_operand.vmem [shape: f32[1,3,16,32], index: 1, kind: input, shape index: {}]   ;;  %s547_s2 = inlined_call_operand.vmem [shape: bf16[16,16], index: 2, kind: input, shape index: {}]   ;;  %s548_s3 = inlined_call_operand.vmem [shape: bf16[32,32], index: 3, kind: input, shape index: {}]   ;;  %s549_s5 = inlined_call_operand.vmem [shape: bf16[64,32], index: 5, kind: input, shape index: {}]   ;;  %s550_s4 = inlined_call_operand.vmem [shape: bf16[8,16], index: 4, kind: input, shape index: {}]   ;;  %s551_s6 = inlined_call_operand.vmem [shape: f32[1,2,32], index: 6, kind: output, shape index: {}]  }
   0x1   :  { %379 = vmatprep.subr.bf16.mxu0 %v421_v0  ;;  %v24_v1 = vld [vmem:[%s545_s0] sm:$0xff]  ;;  %v25_v2 = vld [vmem:[%s545_s0 + $0x8] sm:$0xff]  ;;  %381 = vmatprep.mubr.msk.bf16.mxu0 %vm422_vm0, %v421_v0  ;;  %v348_v6 = vld [vmem:[%s545_s0 + $0x10] sm:$0xff]  ;;  %vm277_vm3 = vcmask 523264   ;;  %vm340_vm4 = vcmask 1040384   ;;  %vm342_vm5 = vcmask 254976  }
   0x2   :  { %v26_v3 = vld [vmem:[%s546_s1] sm:$0xff]  ;;  %v27_v4 = vld [vmem:[%s546_s1 + $0x8] sm:$0xff]  ;;  %v349_v7 = vld [vmem:[%s545_s0 + $0x18] sm:$0xff]  ;;  %399 = vmatprep.subr.bf16.mxu1 %v421_v0  ;;  %407 = vmatprep.mubr.msk.bf16.mxu1 %vm422_vm0, %v421_v0 }
   0x3   :  { %v28_v5 = vsub.f32 %v24_v1, %v26_v3  ;;  %v29_v8 = vsub.f32 %v25_v2, %v27_v4  ;;  %v350_v9 = vld [vmem:[%s546_s1 + $0x10] sm:$0xff]  ;;  %v351_v10 = vld [vmem:[%s546_s1 + $0x18] sm:$0xff]  ;;  %v352_v11 = vld [vmem:[%s545_s0 + $0x20] sm:$0xff] }
   0x4   :  { %v36_v12 = vsub.f32 %v348_v6, %v350_v9  ;;  %v37_v13 = vsub.f32 %v349_v7, %v351_v10  ;;  %v353_v14 = vld [vmem:[%s545_s0 + $0x28] sm:$0xff]  ;;  %v354_v15 = vld [vmem:[%s546_s1 + $0x20] sm:$0xff]  ;;  %v419_v2 = vld [vmem:[%s549_s5 + $0x10] sm:$0xff]  }
   0x5   :  { %v355_v16 = vld [vmem:[%s546_s1 + $0x28] sm:$0xff]  ;;  %v46_v17 = vmul.f32 0.299, %v28_v5  ;;  %v68_v18 = vmul.f32 0.5, %v28_v5  ;;  %v44_v19 = vsub.f32 %v352_v11, %v354_v15  ;;  %v47_v21 = vmul.f32 0.299, %v29_v8 }
   0x6   :  { %v45_v20 = vsub.f32 %v353_v14, %v355_v16  ;;  %v48_v22 = vmul.f32 0.587, %v36_v12  ;;  %v49_v23 = vmul.f32 0.587, %v37_v13  ;;  %v69_v24 = vmul.f32 0.5, %v29_v8  ;;  %v414_v40 = vld [vmem:[%s547_s2] sm:$0xff]  }
   0x7   :  { %v52_v25 = vmul.f32 0.114, %v44_v19  ;;  %v70_v27 = vmul.f32 0.46, %v36_v12  ;;  %v71_v30 = vmul.f32 0.46, %v37_v13 }
   0x8   :  { %v53_v26 = vmul.f32 0.114, %v45_v20  ;;  %v50_v28 = vadd.f32 %v48_v22, %v46_v17  ;;  %v51_v29 = vadd.f32 %v49_v23, %v47_v21  ;;  %v74_v31 = vmul.f32 0.04, %v44_v19  ;;  %v415_v42 = vld [vmem:[%s548_s3] sm:$0xff]   ;;  %v416_v43 = vld [vmem:[%s548_s3 + $0x8] sm:$0xff]  }
   0x9   :  { %v72_v32 = vsub.f32 %v68_v18, %v70_v27  ;;  %v75_v33 = vmul.f32 0.04, %v45_v20  ;;  %v73_v36 = vsub.f32 %v69_v24, %v71_v30  ;;  %v417_v44 = vld [vmem:[%s549_s5] sm:$0xff]   ;;  %v57_v45 = vmul.f32 -0.169, %v28_v5  ;;  %v418_v1 = vld [vmem:[%s549_s5 + $0x8] sm:$0xff]  }
   0xa   :  { %v54_v34 = vadd.f32 %v52_v25, %v50_v28  ;;  %v55_v35 = vadd.f32 %v53_v26, %v51_v29  ;;  %400 = vmatpush3.bf16.msra.mxu1 %v417_v44  ;;  %v58_v46 = vmul.f32 -0.169, %v29_v8  ;;  %v59_v47 = vmul.f32 0.331, %v36_v12  ;;  %v200_v63 = vld [vmem:[%s550_s4] sm:$0xf] }
   0xb   :  { %v76_v37 = vsub.f32 %v72_v32, %v74_v31  ;;  %v77_v39 = vsub.f32 %v73_v36, %v75_v33  ;;  %401 = vmatprep.subr.bf16.mxu1 %v421_v0  ;;  %v60_v48 = vmul.f32 0.331, %v37_v13  ;;  %v63_v51 = vmul.f32 0.5, %v44_v19  ;;  %v420_v3 = vld [vmem:[%s549_s5 + $0x18] sm:$0xff]  }
   0xc   :  { %v56_v38 = vpack.c.bf16 %v55_v35, %v54_v34  ;;  %v61_v49 = vsub.f32 %v57_v45, %v59_v47  ;;  %v64_v52 = vmul.f32 0.5, %v45_v20 }
   0xd   :  { %v78_v41 = vpack.c.bf16 %v77_v39, %v76_v37  ;;  %v62_v50 = vsub.f32 %v58_v46, %v60_v48 }
   0xe   :  { %380 = vmatpush3.bf16.msra.mxu0 %v56_v38  ;;  %v65_v53 = vadd.f32 %v63_v51, %v61_v49  ;;  %402 = vmatpush3.bf16.msra.mxu1 %v418_v1 }
   0xf   :  { %385 = vmatprep.subr.bf16.mxu0 %v421_v0  ;;  %80 = vrot.lane.b32.xlu0 %v78_v41, %s423_s23  ;;  %v66_v54 = vadd.f32 %v64_v52, %v62_v50 }
  0x10   :  { %403 = vmatprep.subr.bf16.mxu1 %v421_v0 }
  0x11   :  { %382 = vmatmul.mubr.msk.bf16.vlgmr.msra.gmra.mrb[0].mxu0 %vm94_vm1, %v414_v40  ;;  %v67_v55 = vpack.c.bf16 %v66_v54, %v65_v53 }
  0x12   :  { %386 = vmatpush3.bf16.msra.mxu0 %v415_v42  ;;  %389 = vmatprep.mubr.msk.bf16.mxu0 %vm422_vm0, %v421_v0 }
  0x13   :  { %387 = vmatprep.subr.bf16.mxu0 %v421_v0  ;;  %404 = vmatpush3.bf16.msra.mxu1 %v419_v2 }
  0x14   :  { %405 = vmatprep.subr.bf16.mxu1 %v421_v0 }
  0x16   :  { %388 = vmatpush3.bf16.msra.mxu0 %v416_v43 }
  0x17   :  { %393 = vmatprep.subr.bf16.mxu0 %v421_v0  ;;  %406 = vmatpush3.bf16.msra.mxu1 %v420_v3 }
  0x81   :  { %v81_v57 = vpop.permute.xlu0 %80 }
  0x82   :  { %v85_v61 = vsel %vm82_vm2, %v67_v55, %v81_v57 }
  0xe4   :  { %v132_v56 = vpop.f32.mrb[0].mxu0 }
  0xe5   :  { %v383_v58 = vpop.f32.mrb[1].mxu0 }
  0xe6   :  { %v135_v59 = vpop.f32.mrb[2].mxu0 }
  0xe7   :  { %v139_v60 = vpack.c.bf16 %v135_v59, %v132_v56  ;;  %v384_v62 = vpop.f32.mrb[3].mxu0 }
  0xe9   :  { %390 = vmatmul.mubr.msk.bf16.vlgmr.msra.gmra.mrb[4].mxu0 %vm82_vm2, %v139_v60 }
  0xea   :  { %394 = vmatpush3.bf16.msra.mxu0 %v85_v61  ;;  %395 = vmatprep.mubr.msk.bf16.mxu0 %vm422_vm0, %v421_v0 }
  0xf1   :  { %396 = vmatmul.mubr.msk.bf16.vlgmr.msra.gmra.mrb[8].mxu0 %vm94_vm1, %v200_v63 }
 0x1bc   :  { %v193_v4 = vpop.f32.mrb[4].mxu0 }
 0x1bd   :  { %v321_v5 = vmul.f32 %v193_v4, %v193_v4  ;;  %v391_v6 = vpop.f32.mrb[5].mxu0 }
 0x1be   :  { %v196_v7 = vpop.f32.mrb[6].mxu0 }
 0x1bf   :  { %v322_v8 = vmul.f32 %v196_v7, %v196_v7  ;;  %v392_v9 = vpop.f32.mrb[7].mxu0  ;;  %v323_v10 = vsel %vm82_vm2, %v321_v5, 0.0 }
 0x1c1   :  { %v324_v11 = vsel %vm82_vm2, %v322_v8, 0.0 }
 0x1c2   :  { %v325_v12 = vadd.f32 %v324_v11, %v323_v10 }
 0x1c4   :  { %v238_v13 = vpop.f32.mrb[8].mxu0  ;;  %v326_v17 = vrot.slane %v325_v12, 4 }
 0x1c5   :  { %v244_v14 = vpack.c.bf16 %v238_v13, %v238_v13  ;;  %v397_v0 = vpop.f32.mrb[9].mxu0 }
 0x1c6   :  { %v241_v15 = vpop.f32.mrb[10].mxu0  ;;  %v327_v18 = vadd.f32 %v326_v17, %v325_v12 }
 0x1c7   :  { %v398_v16 = vpop.f32.mrb[11].mxu0  ;;  %408 = vmatmul.mubr.msk.bf16.vlgmr.msra.gmra.mrb[0].mxu1 %vm277_vm3, %v244_v14 }
 0x1c8   :  { %v328_v22 = vrot.slane %v327_v18, 2 }
 0x1ca   :  { %v329_v27 = vadd.f32 %v328_v22, %v327_v18 }
 0x1cc   :  { %v330_v30 = vrot.slane %v329_v27, 1 }
 0x1ce   :  { %v331_v33 = vadd.f32 %v330_v30, %v329_v27 }
 0x29a   :  { %v315_v19 = vpop.f32.mrb[0].mxu1 }
 0x29b   :  { %v332_v20 = vmul.f32 %v315_v19, %v315_v19  ;;  %v409_v21 = vpop.f32.mrb[1].mxu1 }
 0x29c   :  { %v318_v23 = vpop.f32.mrb[2].mxu1 }
 0x29d   :  { %v333_v24 = vsel %vm82_vm2, %v332_v20, 0.0  ;;  %v410_v25 = vpop.f32.mrb[3].mxu1 }
 0x29e   :  { %v334_v26 = vrot.slane %v333_v24, 4 }
 0x2a0   :  { %v335_v28 = vadd.f32 %v334_v26, %v333_v24 }
 0x2a2   :  { %v336_v29 = vrot.slane %v335_v28, 2 }
 0x2a4   :  { %v337_v31 = vadd.f32 %v336_v29, %v335_v28 }
 0x2a6   :  { %v338_v32 = vrot.slane %v337_v31, 1 }
 0x2a8   :  { %v339_v34 = vadd.f32 %v338_v32, %v337_v31 }
 0x2aa   :  { %v341_v35 = vsel %vm340_vm4, %v331_v33, %v339_v34 }
 0x2ab   :  { %343 = vst.msk [vmem:[%s551_s6] sm:$0x3] %vm342_vm5, %v341_v35 }

</bundles_post_ra>
